<compile_context>
chip_gen: v6e
topology: v6e:2x2x1
jax: 0.10.0
libtpu: 0.0.40
codegen_flags: <defaults>
</compile_context>

<pallas_src>
import jax
import jax.numpy as jnp
from jax.experimental import pallas as pl
from jax.experimental.pallas import tpu as pltpu

HIDDEN_SIZE = 8
NUM_LAYERS = 2
OUTPUT_SIZE = 3
CLS_PAD = 8                       # class dim padded to one sublane group (3 real + 5 pad)
VMEM_BUDGET = 32 * 1024 * 1024    # target working set; safe on v5e/v6e/v7x


# ----------------------------- kernel ---------------------------------------

def _reduced_cell(inp, wih_t_ref, b_ref, H):
    """Zero-state LSTM cell; gate columns pre-ordered [i, o, g] (forget gate dropped)."""
    gates = jnp.dot(inp, wih_t_ref[...], preferred_element_type=jnp.float32) + b_ref[...]
    sg = jax.nn.sigmoid(gates)          # one EUP pass covers i and o
    tg = jnp.tanh(gates)                # one EUP pass covers g
    i = sg[:, 0 * H:1 * H]
    o = sg[:, 1 * H:2 * H]
    g = tg[:, 2 * H:3 * H]
    c = i * g                           # c_prev == 0
    return o * jnp.tanh(c)              # f32 (TB, H)


def cefr_lstm_kernel(x_ref,
                     wih1_ref, b1_ref,
                     wih2_ref, b2_ref,
                     wfc_ref, bfc_ref,
                     out_ref):
    H = HIDDEN_SIZE

    # layer 1: cast the native-dtype x tile to bf16 on the VPU (no wrapper pre-pass);
    # bf16 MXU matmul with f32 accumulation.
    h1 = _reduced_cell(x_ref[...].astype(jnp.bfloat16), wih1_ref, b1_ref, H)

    # layer 2: tiny bf16 MXU matmul (inter-layer dropout is a no-op at inference).
    h2 = _reduced_cell(h1.astype(jnp.bfloat16), wih2_ref, b2_ref, H)

    # transposed FC: (CLS_PAD, H) @ (H, TB) -> (CLS_PAD, TB).  Pad rows have zero
    # weights and a -1e30 bias, so they vanish under the softmax.
    logits_t = (jnp.dot(wfc_ref[...], h2.T, preferred_element_type=jnp.float32)
                + bfc_ref[...])

    # stable softmax over the class (sublane) axis; lane-dense (CLS_PAD, TB) store.
    m = jnp.max(logits_t, axis=0, keepdims=True)
    e = jnp.exp(logits_t - m)                       # pad rows -> exp(-huge) == 0
    s = jnp.sum(e, axis=0, keepdims=True)
    out_ref[...] = (e * pl.reciprocal(s, approx=False)).astype(out_ref.dtype)


# ----------------------------- wrapper ---------------------------------------

def _working_set_bytes(tb, input_size, x_itemsize):
    x_buf = 2 * tb * input_size * x_itemsize        # double-buffered x tile
    out_buf = 2 * CLS_PAD * tb * 4                  # double-buffered transposed out tile
    w_buf = 2 * input_size * 3 * HIDDEN_SIZE * 2    # bf16 W_ih(l0), counted x2
    scratch = 8 * tb * 3 * HIDDEN_SIZE * 4          # gates / intermediates headroom
    return x_buf + out_buf + w_buf + scratch


def _auto_batch_tile(B, input_size, x_itemsize):
    # Single tile when the whole batch fits (blocks == full dims, no masking at all);
    # otherwise a multiple of 128 so the transposed output store stays lane-dense.
    if B <= 128 or _working_set_bytes(B, input_size, x_itemsize) <= VMEM_BUDGET:
        return B
    for tb in (2048, 1024, 512, 256, 128):
        if tb < B and _working_set_bytes(tb, input_size, x_itemsize) <= VMEM_BUDGET:
            return tb
    return 128


def cefr_lstm_forward(x, params, *, batch_tile=None):
    """x: (B, input_size) float32 (or bfloat16).  Returns (B, OUTPUT_SIZE) softmax probs."""
    kp = params["kernel"]
    B, I = x.shape
    H = HIDDEN_SIZE
    itemsize = jnp.dtype(x.dtype).itemsize

    TB = batch_tile if batch_tile is not None else _auto_batch_tile(B, I, itemsize)
    if TB < B:
        assert TB % 128 == 0, "multi-tile batch tiles must be a multiple of 128"
    grid = pl.cdiv(B, TB)

    # Explicit scoped-VMEM budget (v5e defaults to only 16 MiB); capped for v7x (64 MiB phys).
    vmem_limit = int(min(56 << 20,
                         max(16 << 20, _working_set_bytes(TB, I, itemsize) + (4 << 20))))

    weight_args = (kp["wih1_t"], kp["b1"], kp["wih2_t"], kp["b2"], kp["wfc"], kp["bfc"])
    weight_bytes = sum(int(w.size) * jnp.dtype(w.dtype).itemsize for w in weight_args)
    cost = pl.CostEstimate(
        flops=2 * B * (I * 3 * H + H * 3 * H + H * CLS_PAD),
        transcendentals=B * (4 * 3 * H + 2 * H + CLS_PAD),
        bytes_accessed=B * I * itemsize + CLS_PAD * B * 4 + weight_bytes,
    )

    const = lambda i: (0, 0)    # weights: same block every grid step -> VMEM-resident
    out_t = pl.pallas_call(
        cefr_lstm_kernel,
        out_shape=jax.ShapeDtypeStruct((CLS_PAD, B), jnp.float32),
        grid_spec=pltpu.PrefetchScalarGridSpec(
            num_scalar_prefetch=0,
            grid=(grid,),
            in_specs=[
                pl.BlockSpec((TB, I), lambda i: (i, 0)),   # x tile (double-buffered DMA)
                pl.BlockSpec(kp["wih1_t"].shape, const),
                pl.BlockSpec(kp["b1"].shape, const),
                pl.BlockSpec(kp["wih2_t"].shape, const),
                pl.BlockSpec(kp["b2"].shape, const),
                pl.BlockSpec(kp["wfc"].shape, const),
                pl.BlockSpec(kp["bfc"].shape, const),
            ],
            out_specs=pl.BlockSpec((CLS_PAD, TB), lambda i: (0, i)),
        ),
        compiler_params=pltpu.CompilerParams(
            dimension_semantics=("parallel",),
            vmem_limit_bytes=vmem_limit),
        cost_estimate=cost,
    )(x, *weight_args)

    # tiny (3, B) slice + transpose back to the PyTorch (B, 3) layout
    return out_t[:OUTPUT_SIZE, :].T


# ----------------------------- params / reference ----------------------------

def _reorder_iog(w4h):
    """(4H, ...) PyTorch gate rows [i, f, g, o] -> (3H, ...) rows [i, o, g]; f dropped."""
    H = HIDDEN_SIZE
    return jnp.concatenate([w4h[0:H], w4h[3 * H:4 * H], w4h[2 * H:3 * H]], axis=0)


def init_params(key, input_size, hidden_size):
    """Deterministic init mirroring nn.LSTM / nn.Linear (uniform +-1/sqrt(H)).

    Returns both the raw PyTorch-shaped weights (for the f32 reference) and the
    kernel-prepped weights (f gate / W_hh dropped, gates reordered [i, o, g], combined
    biases, bf16 gate weights, FC padded to CLS_PAD classes for the transposed store).
    """
    ks = jax.random.split(key, 10)
    bound = 1.0 / jnp.sqrt(hidden_size)
    u = lambda k, shape: jax.random.uniform(k, shape, jnp.float32, -bound, bound)

    raw = {
        "w_ih0": u(ks[0], (4 * hidden_size, input_size)),
        "w_hh0": u(ks[1], (4 * hidden_size, hidden_size)),
        "b_ih0": u(ks[2], (4 * hidden_size,)),
        "b_hh0": u(ks[3], (4 * hidden_size,)),
        "w_ih1": u(ks[4], (4 * hidden_size, hidden_size)),
        "w_hh1": u(ks[5], (4 * hidden_size, hidden_size)),
        "b_ih1": u(ks[6], (4 * hidden_size,)),
        "b_hh1": u(ks[7], (4 * hidden_size,)),
        "w_fc": u(ks[8], (OUTPUT_SIZE, hidden_size)),
        "b_fc": u(ks[9], (OUTPUT_SIZE,)),
    }

    wfc_pad = jnp.zeros((CLS_PAD, hidden_size), jnp.float32).at[:OUTPUT_SIZE].set(raw["w_fc"])
    bfc_pad = jnp.full((CLS_PAD, 1), -1e30, jnp.float32).at[:OUTPUT_SIZE, 0].set(raw["b_fc"])

    kernel = {
        "wih1_t": _reorder_iog(raw["w_ih0"]).T.astype(jnp.bfloat16),   # (I, 3H) bf16
        "b1": _reorder_iog(raw["b_ih0"] + raw["b_hh0"])[None, :],      # (1, 3H) f32
        "wih2_t": _reorder_iog(raw["w_ih1"]).T.astype(jnp.bfloat16),   # (H, 3H) bf16
        "b2": _reorder_iog(raw["b_ih1"] + raw["b_hh1"])[None, :],      # (1, 3H) f32
        "wfc": wfc_pad,                                                # (CLS_PAD, H) f32
        "bfc": bfc_pad,                                                # (CLS_PAD, 1) f32
    }
    return {"raw": raw, "kernel": kernel}


def reference_forward(x, params):
    """Pure-JAX f32 reference with the FULL original LSTM math (W_hh, forget gate, ...)."""
    p = params["raw"]
    H = HIDDEN_SIZE
    B = x.shape[0]
    inp = x
    for layer in range(NUM_LAYERS):
        w_ih, w_hh = p[f"w_ih{layer}"], p[f"w_hh{layer}"]
        b = p[f"b_ih{layer}"] + p[f"b_hh{layer}"]
        h_prev = jnp.zeros((B, H), jnp.float32)
        c_prev = jnp.zeros((B, H), jnp.float32)
        g = inp @ w_ih.T + h_prev @ w_hh.T + b
        i = jax.nn.sigmoid(g[:, 0 * H:1 * H])
        f = jax.nn.sigmoid(g[:, 1 * H:2 * H])
        gg = jnp.tanh(g[:, 2 * H:3 * H])
        o = jax.nn.sigmoid(g[:, 3 * H:4 * H])
        c = f * c_prev + i * gg
        inp = o * jnp.tanh(c)
    logits = inp @ p["w_fc"].T + p["b_fc"]
    return jax.nn.softmax(logits, axis=1)


if __name__ == "__main__":
    key = jax.random.PRNGKey(0)
    k_x, k_x2, k_p = jax.random.split(key, 3)

    batch = 4
    input_size = 16   # stands in for tfidf(5000) + scaled numeric features

    params = init_params(k_p, input_size, HIDDEN_SIZE)

    # --- small single-tile case (TB == B, blocks == full dims) ---
    x = jax.random.normal(k_x, (batch, input_size), jnp.float32)
    out = jax.block_until_ready(cefr_lstm_forward(x, params))
    ref = jax.block_until_ready(reference_forward(x, params))
    assert out.shape == (batch, OUTPUT_SIZE)
    # bf16 gate matmuls vs f32 reference -> loosened tolerance
    assert jnp.allclose(out, ref, atol=2e-2, rtol=2e-2), "mismatch vs f32 reference"
    assert jnp.allclose(jnp.sum(out, axis=1), 1.0, atol=1e-3), "softmax rows must sum to 1"

    # --- multi-tile ragged case (no pad copy; last block OOB-masked) ---
    batch2 = 300
    x2 = jax.random.normal(k_x2, (batch2, input_size), jnp.float32)
    out2 = jax.block_until_ready(cefr_lstm_forward(x2, params, batch_tile=128))
    ref2 = jax.block_until_ready(reference_forward(x2, params))
    assert out2.shape == (batch2, OUTPUT_SIZE)
    assert jnp.allclose(out2, ref2, atol=2e-2, rtol=2e-2), "ragged-grid mismatch vs reference"

    print("KERNEL_OK")
</pallas_src>

<mosaic_0001>
module attributes {stable_mosaic.version = 11 : i64} {
  func.func @cefr_lstm_kernel(%arg0: i32, %arg1: memref<4x16xf32, #tpu.memory_space<vmem>>, %arg2: memref<16x24xbf16, #tpu.memory_space<vmem>>, %arg3: memref<1x24xf32, #tpu.memory_space<vmem>>, %arg4: memref<8x24xbf16, #tpu.memory_space<vmem>>, %arg5: memref<1x24xf32, #tpu.memory_space<vmem>>, %arg6: memref<8x8xf32, #tpu.memory_space<vmem>>, %arg7: memref<8x1xf32, #tpu.memory_space<vmem>>, %arg8: memref<8x4xf32, #tpu.memory_space<vmem>>) attributes {dimension_semantics = [#tpu.dimension_semantics<parallel>], iteration_bounds = array<i64: 1>, scalar_prefetch = 0 : i64, scratch_operands = 0 : i64, tpu.core_type = #tpu.core_type<tc>, window_params = [{transform_indices = @transform_0, window_bounds = array<i64: 4, 16>}, {pipeline_mode = #tpu.pipeline_mode<synchronous>, transform_indices = @transform_1, window_bounds = array<i64: 16, 24>}, {pipeline_mode = #tpu.pipeline_mode<synchronous>, transform_indices = @transform_2, window_bounds = array<i64: 1, 24>}, {pipeline_mode = #tpu.pipeline_mode<synchronous>, transform_indices = @transform_3, window_bounds = array<i64: 8, 24>}, {pipeline_mode = #tpu.pipeline_mode<synchronous>, transform_indices = @transform_4, window_bounds = array<i64: 1, 24>}, {pipeline_mode = #tpu.pipeline_mode<synchronous>, transform_indices = @transform_5, window_bounds = array<i64: 8, 8>}, {pipeline_mode = #tpu.pipeline_mode<synchronous>, transform_indices = @transform_6, window_bounds = array<i64: 8, 1>}, {transform_indices = @transform_7, window_bounds = array<i64: 8, 4>}]} {
    %c0 = arith.constant 0 : index
    %c0_0 = arith.constant 0 : index
    %0 = vector.load %arg1[%c0, %c0_0] : memref<4x16xf32, #tpu.memory_space<vmem>>, vector<4x16xf32>
    %1 = arith.truncf %0 : vector<4x16xf32> to vector<4x16xbf16>
    %c0_1 = arith.constant 0 : index
    %c0_2 = arith.constant 0 : index
    %2 = vector.load %arg2[%c0_1, %c0_2] : memref<16x24xbf16, #tpu.memory_space<vmem>>, vector<16x24xbf16>
    %cst = arith.constant dense<0.000000e+00> : vector<4x24xf32>
    %3 = tpu.matmul %1, %2, %cst {dimension_numbers = #tpu.dot_dimension_numbers<[1], [0], [0], [1], [0, 0, 1, 1], [], []>} : vector<4x16xbf16>, vector<16x24xbf16>, vector<4x24xf32> -> vector<4x24xf32>
    %c0_3 = arith.constant 0 : index
    %c0_4 = arith.constant 0 : index
    %4 = vector.load %arg3[%c0_3, %c0_4] : memref<1x24xf32, #tpu.memory_space<vmem>>, vector<1x24xf32>
    %5 = vector.broadcast %4 : vector<1x24xf32> to vector<4x24xf32>
    %6 = arith.addf %3, %5 : vector<4x24xf32>
    %7 = arith.negf %6 : vector<4x24xf32>
    %8 = math.exp %7 : vector<4x24xf32>
    %cst_5 = arith.constant 1.000000e+00 : f32
    %9 = vector.broadcast %cst_5 : f32 to vector<4x24xf32>
    %10 = arith.addf %9, %8 : vector<4x24xf32>
    %11 = arith.divf %9, %10 : vector<4x24xf32>
    %12 = math.tanh %6 : vector<4x24xf32>
    %13 = vector.extract_strided_slice %11 {offsets = [0, 0], sizes = [4, 8], strides = [1, 1]} : vector<4x24xf32> to vector<4x8xf32>
    %14 = vector.extract_strided_slice %11 {offsets = [0, 8], sizes = [4, 8], strides = [1, 1]} : vector<4x24xf32> to vector<4x8xf32>
    %15 = vector.extract_strided_slice %12 {offsets = [0, 16], sizes = [4, 8], strides = [1, 1]} : vector<4x24xf32> to vector<4x8xf32>
    %16 = arith.mulf %13, %15 : vector<4x8xf32>
    %17 = math.tanh %16 : vector<4x8xf32>
    %18 = arith.mulf %14, %17 : vector<4x8xf32>
    %19 = arith.truncf %18 : vector<4x8xf32> to vector<4x8xbf16>
    %c0_6 = arith.constant 0 : index
    %c0_7 = arith.constant 0 : index
    %20 = vector.load %arg4[%c0_6, %c0_7] : memref<8x24xbf16, #tpu.memory_space<vmem>>, vector<8x24xbf16>
    %cst_8 = arith.constant dense<0.000000e+00> : vector<4x24xf32>
    %21 = tpu.matmul %19, %20, %cst_8 {dimension_numbers = #tpu.dot_dimension_numbers<[1], [0], [0], [1], [0, 0, 1, 1], [], []>} : vector<4x8xbf16>, vector<8x24xbf16>, vector<4x24xf32> -> vector<4x24xf32>
    %c0_9 = arith.constant 0 : index
    %c0_10 = arith.constant 0 : index
    %22 = vector.load %arg5[%c0_9, %c0_10] : memref<1x24xf32, #tpu.memory_space<vmem>>, vector<1x24xf32>
    %23 = vector.broadcast %22 : vector<1x24xf32> to vector<4x24xf32>
    %24 = arith.addf %21, %23 : vector<4x24xf32>
    %25 = arith.negf %24 : vector<4x24xf32>
    %26 = math.exp %25 : vector<4x24xf32>
    %cst_11 = arith.constant 1.000000e+00 : f32
    %27 = vector.broadcast %cst_11 : f32 to vector<4x24xf32>
    %28 = arith.addf %27, %26 : vector<4x24xf32>
    %29 = arith.divf %27, %28 : vector<4x24xf32>
    %30 = math.tanh %24 : vector<4x24xf32>
    %31 = vector.extract_strided_slice %29 {offsets = [0, 0], sizes = [4, 8], strides = [1, 1]} : vector<4x24xf32> to vector<4x8xf32>
    %32 = vector.extract_strided_slice %29 {offsets = [0, 8], sizes = [4, 8], strides = [1, 1]} : vector<4x24xf32> to vector<4x8xf32>
    %33 = vector.extract_strided_slice %30 {offsets = [0, 16], sizes = [4, 8], strides = [1, 1]} : vector<4x24xf32> to vector<4x8xf32>
    %34 = arith.mulf %31, %33 : vector<4x8xf32>
    %35 = math.tanh %34 : vector<4x8xf32>
    %36 = arith.mulf %32, %35 : vector<4x8xf32>
    %c0_12 = arith.constant 0 : index
    %c0_13 = arith.constant 0 : index
    %37 = vector.load %arg6[%c0_12, %c0_13] : memref<8x8xf32, #tpu.memory_space<vmem>>, vector<8x8xf32>
    %38 = tpu.transpose %36, [1, 0] : vector<4x8xf32> -> vector<8x4xf32>
    %cst_14 = arith.constant dense<0.000000e+00> : vector<8x4xf32>
    %39 = tpu.matmul %37, %38, %cst_14 {dimension_numbers = #tpu.dot_dimension_numbers<[1], [0], [0], [1], [0, 0, 1, 1], [], []>} : vector<8x8xf32>, vector<8x4xf32>, vector<8x4xf32> -> vector<8x4xf32>
    %c0_15 = arith.constant 0 : index
    %c0_16 = arith.constant 0 : index
    %40 = vector.load %arg7[%c0_15, %c0_16] : memref<8x1xf32, #tpu.memory_space<vmem>>, vector<8x1xf32>
    %41 = vector.broadcast %40 : vector<8x1xf32> to vector<8x4xf32>
    %42 = arith.addf %39, %41 : vector<8x4xf32>
    %cst_17 = arith.constant dense<0xFF800000> : vector<4xf32>
    %43 = vector.multi_reduction <maximumf>, %42, %cst_17 [0] : vector<8x4xf32> to vector<4xf32>
    %44 = vector.shape_cast %43 : vector<4xf32> to vector<1x4xf32>
    %45 = vector.broadcast %44 : vector<1x4xf32> to vector<8x4xf32>
    %46 = arith.subf %42, %45 : vector<8x4xf32>
    %47 = math.exp %46 : vector<8x4xf32>
    %cst_18 = arith.constant dense<0.000000e+00> : vector<4xf32>
    %48 = vector.multi_reduction <add>, %47, %cst_18 [0] : vector<8x4xf32> to vector<4xf32>
    %49 = vector.shape_cast %48 : vector<4xf32> to vector<1x4xf32>
    %50 = tpu.reciprocal %49 : vector<1x4xf32> -> vector<1x4xf32>
    %51 = vector.broadcast %50 : vector<1x4xf32> to vector<8x4xf32>
    %52 = arith.mulf %47, %51 : vector<8x4xf32>
    %c0_19 = arith.constant 0 : index
    %c0_20 = arith.constant 0 : index
    %53 = vector.load %arg8[%c0_19, %c0_20] : memref<8x4xf32, #tpu.memory_space<vmem>>, vector<8x4xf32>
    tpu.vector_store %arg8[%c0_19, %c0_20], %52 {strides = array<i32>} : memref<8x4xf32, #tpu.memory_space<vmem>>, vector<8x4xf32>,
    return
  }
  func.func @transform_0(%arg0: i32) -> (i32, i32) {
    %c0_i32 = arith.constant 0 : i32
    %c0_i32_0 = arith.constant 0 : i32
    return %arg0, %c0_i32 : i32, i32
  }
  func.func @transform_1(%arg0: i32) -> (i32, i32) {
    %c0_i32 = arith.constant 0 : i32
    %c0_i32_0 = arith.constant 0 : i32
    %c0_i32_1 = arith.constant 0 : i32
    return %c0_i32, %c0_i32_0 : i32, i32
  }
  func.func @transform_2(%arg0: i32) -> (i32, i32) {
    %c0_i32 = arith.constant 0 : i32
    %c0_i32_0 = arith.constant 0 : i32
    %c0_i32_1 = arith.constant 0 : i32
    return %c0_i32, %c0_i32_0 : i32, i32
  }
  func.func @transform_3(%arg0: i32) -> (i32, i32) {
    %c0_i32 = arith.constant 0 : i32
    %c0_i32_0 = arith.constant 0 : i32
    %c0_i32_1 = arith.constant 0 : i32
    return %c0_i32, %c0_i32_0 : i32, i32
  }
  func.func @transform_4(%arg0: i32) -> (i32, i32) {
    %c0_i32 = arith.constant 0 : i32
    %c0_i32_0 = arith.constant 0 : i32
    %c0_i32_1 = arith.constant 0 : i32
    return %c0_i32, %c0_i32_0 : i32, i32
  }
  func.func @transform_5(%arg0: i32) -> (i32, i32) {
    %c0_i32 = arith.constant 0 : i32
    %c0_i32_0 = arith.constant 0 : i32
    %c0_i32_1 = arith.constant 0 : i32
    return %c0_i32, %c0_i32_0 : i32, i32
  }
  func.func @transform_6(%arg0: i32) -> (i32, i32) {
    %c0_i32 = arith.constant 0 : i32
    %c0_i32_0 = arith.constant 0 : i32
    %c0_i32_1 = arith.constant 0 : i32
    return %c0_i32, %c0_i32_0 : i32, i32
  }
  func.func @transform_7(%arg0: i32) -> (i32, i32) {
    %c0_i32 = arith.constant 0 : i32
    %c0_i32_0 = arith.constant 0 : i32
    return %c0_i32, %arg0 : i32, i32
  }
}

</mosaic_0001>

<bundles_post_ra>
// kernel: tpu_custom_call.1
= control target key start
LH: loop header
LB: loop body
LE: loop exit
PB: predicated region body
PF: predicated region fallthrough
CT: control target
= control target key end

     0   :  { %12 = vsyncpa [#allocation3], 0  ;;  %s578_s0 = inlined_call_operand.hbm [shape: f32[4,16], index: 0, kind: input, shape index: {}]   ;;  %s579_s1 = inlined_call_operand.vmem [shape: bf16[16,24], index: 1, kind: input, shape index: {}]   ;;  %s580_s2 = inlined_call_operand.hbm [shape: f32[1,24], index: 2, kind: input, shape index: {}]   ;;  %s581_s3 = inlined_call_operand.hbm [shape: bf16[8,24], index: 3, kind: input, shape index: {}]   ;;  %s582_s4 = inlined_call_operand.hbm [shape: f32[1,24], index: 4, kind: input, shape index: {}]   ;;  %s583_s5 = inlined_call_operand.vmem [shape: f32[8,8], index: 5, kind: input, shape index: {}]   ;;  %s584_s6 = inlined_call_operand.vmem [shape: f32[8,1], index: 6, kind: input, shape index: {}]   ;;  %s585_s7 = inlined_call_operand.vmem [shape: f32[8,4], index: 7, kind: output, shape index: {}]  }
   0x1   :  { %13 = vsyncpa [#allocation5], 0 }
   0x2   :  { %14 = vsyncpa [#allocation8], 0  ;;  %s494_s24 = smov [#allocation4]   ;;  %s495_s26 = smov [#allocation2]  }
   0x3   :  { %s33_s25 = sshll.u32 %s494_s24, 4  ;;  %s21_s27 = sshll.u32 %s495_s26, 4  ;;  %s34_s25 = int_to_ptr.vmem [resolvable:$true] %s33_s25  ;;  %s22_s27 = int_to_ptr.vmem [resolvable:$true] %s21_s27 }
   0x4   :  { %s416_s28 = scalar_lea.vmem %s34_s25, 16  ;;  %s420_s29 = scalar_lea.vmem %s34_s25, 32 }
   0x5   :  { %p417_p0 = scmp.ne.s32.totalorder %s34_s25, %s416_s28  ;;  %p421_p1 = scmp.lt.s32.totalorder %s34_s25, %s34_s25 }
   0x6   :  { %p422_p2 = scmp.lt.s32.totalorder %s420_s29, %s416_s28 }
   0x8   :  { %p423_p3 = por %p422_p2, %p421_p1 }
   0xa   :  { %p424_p4 = pnand %p423_p3, %p417_p0 }
   0xc   :  { %427 = shalt.err (!%p424_p4)
}
   0xd   :  { %36 = dma.hbm_to_vmem [thread:$0]  %s580_s2, 16, %s34_s25, [#allocation5]  }
   0xe   :  { %s436_s9 = scalar_lea.vmem %s22_s27, 64  ;;  %p441_p6 = scmp.lt.s32.totalorder %s22_s27, %s22_s27 }
   0xf   :  { %p437_p5 = scmp.ne.s32.totalorder %s22_s27, %s436_s9  ;;  %p442_p7 = scmp.lt.s32.totalorder %s436_s9, %s436_s9 }
  0x11   :  { %p443_p8 = por %p442_p7, %p441_p6 }
  0x13   :  { %p444_p9 = pnand %p443_p8, %p437_p5 }
  0x15   :  { %447 = shalt.err (!%p444_p9)
}
  0x16   :  { %24 = dma.hbm_to_vmem [thread:$0]  %s578_s0, 64, %s22_s27, [#allocation3]  }
  0x17   :  { %s496_s12 = smov [#allocation6]   ;;  %s497_s14 = smov [#allocation7]  }
  0x18   :  { %s43_s13 = sshll.u32 %s496_s12, 4  ;;  %s53_s15 = sshll.u32 %s497_s14, 4  ;;  %s44_s13 = int_to_ptr.vmem [resolvable:$true] %s43_s13  ;;  %s54_s15 = int_to_ptr.vmem [resolvable:$true] %s53_s15 }
  0x19   :  { %s456_s16 = scalar_lea.vmem %s44_s13, 64  ;;  %p461_p11 = scmp.lt.s32.totalorder %s44_s13, %s44_s13 }
  0x1a   :  { %p457_p10 = scmp.ne.s32.totalorder %s44_s13, %s456_s16  ;;  %p462_p12 = scmp.lt.s32.totalorder %s456_s16, %s456_s16 }
  0x1c   :  { %p463_p13 = por %p462_p12, %p461_p11 }
  0x1e   :  { %p464_p0 = pnand %p463_p13, %p457_p10 }
  0x20   :  { %467 = shalt.err (!%p464_p0)
}
  0x21   :  { %46 = dma.hbm_to_vmem [thread:$0]  %s581_s3, 64, %s44_s13, [#allocation5]  }
  0x22   :  { %s476_s18 = scalar_lea.vmem %s54_s15, 16  ;;  %s480_s0 = scalar_lea.vmem %s54_s15, 32 }
  0x23   :  { %p477_p1 = scmp.ne.s32.totalorder %s54_s15, %s476_s18  ;;  %p481_p2 = scmp.lt.s32.totalorder %s54_s15, %s54_s15 }
  0x24   :  { %p482_p3 = scmp.lt.s32.totalorder %s480_s0, %s476_s18 }
  0x26   :  { %p483_p4 = por %p482_p3, %p481_p2 }
  0x28   :  { %p484_p5 = pnand %p483_p4, %p477_p1 }
  0x2a   :  { %487 = shalt.err (!%p484_p5)
}
  0x2b   :  { %56 = dma.hbm_to_vmem [thread:$0]  %s582_s4, 16, %s54_s15, [#allocation8]  }
  0x2c   :  { %488 = dma.done.wait [#allocation3], 64  }
  0x2d   :  { %489 = vsyncadd [#allocation3], 4294967232 }
  0x2e   :  { %490 = dma.done.wait [#allocation5], 80  }
  0x2f   :  { %491 = vsyncadd [#allocation5], 4294967216 }
  0x30   :  { %492 = dma.done.wait [#allocation8], 16  }
  0x31   :  { %493 = vsyncadd [#allocation8], 4294967280  ;;  %v498_v0 = vmov 0.0   ;;  %vm499_vm0 = vmmov 0   ;;  %v387_v1 = vld [vmem:[%s579_s1] sm:$0xff]   ;;  %vm91_vm1 = vcmask 130048  }
  0x32   :  { %359 = vmatprep.subr.bf16.mxu0 %v498_v0  ;;  %361 = vmatprep.mubr.msk.bf16.mxu0 %vm499_vm0, %v498_v0  ;;  %v74_v2 = vld [vmem:[#allocation2] sm:$0xf]  ;;  %v344_v4 = vld [vmem:[#allocation4] ss:$0 sm:$0xff]  ;;  %s500_s4 = smov 112   ;;  %vm169_vm2 = vcmask 1043456  }
  0x33   :  { %365 = vmatprep.subr.bf16.mxu1 %v498_v0  ;;  %367 = vmatprep.mubr.msk.bf16.mxu1 %vm499_vm0, %v498_v0  ;;  %v75_v3 = vpack.c.bf16 %v74_v2, %v74_v2  ;;  %v154_v17 = vld [vmem:[#allocation6] sm:$0xf]  ;;  %s501_s1 = smov 8   ;;  %s502_s22 = smov 120   ;;  %vm165_vm3 = vcmask 64512   ;;  %v503_v39 = vmov 0  }
  0x34   :  { %360 = vmatpush3.bf16.msra.mxu0 %v387_v1  ;;  %v171_v18 = vsel %vm169_vm2, %v154_v17, 0  ;;  %v348_v24 = vld [vmem:[#allocation7] ss:$0 sm:$0xff]  ;;  %v232_v38 = vld [vmem:[%s584_s6] sm:$0xff]  ;;  %386 = vset.pattern.permute.xlu0 %v503_v39  ;;  %vm316_vm4 = vcmask 31744  }
  0x35   :  { %371 = vmatprep.subr.mxu0 %v498_v0  ;;  %366 = vmatpush3.bf16.msra.mxu1 %v171_v18  ;;  %v231_v43 = vld [vmem:[%s583_s5] sm:$0xff] }
  0x37   :  { %362 = vmatmul.mubr.msk.bf16.vlgmr.msra.gmra.mxu0 %vm91_vm1, %v75_v3 }
  0x38   :  { %373 = vmatprep.mubr.msk.f32.mxu0 %vm499_vm0, %v498_v0 }
  0xf7   :  { %v129_v5 = vpop.f32.mrf.mxu0 }
  0xf8   :  { %v130_v6 = vadd.f32 %v344_v4, %v129_v5 }
  0xf9   :  { %v363_v7 = vpop.f32.mrf.mxu0 }
  0xfa   :  { %388 = vtanh.f32 %v130_v6  ;;  %v347_v11 = vmul.f32 -1.442695, %v130_v6 }
  0xfb   :  { %v132_v8 = vpop.f32.mrf.mxu0 }
  0xfc   :  { %390 = vpow2.f32 %v347_v11 }
  0xfd   :  { %v364_v9 = vpop.f32.mrf.mxu0 }
 0x107   :  { %v389_v10 = vpop.eup %388 }
 0x108   :  { %143 = vrot.lane.b32.xlu0 %v389_v10, %s500_s4 }
 0x109   :  { %v391_v12 = vpop.eup %390 }
 0x10a   :  { %v138_v13 = vadd.f32 1.0, %v391_v12 }
 0x10c   :  { %392 = vrcp.f32 %v138_v13 }
 0x119   :  { %v393_v14 = vpop.eup %392 }
 0x17a   :  { %v144_v15 = vpop.permute.xlu0 %143 }
 0x17b   :  { %v146_v16 = vmul.f32 %v393_v14, %v144_v15 }
 0x17d   :  { %394 = vtanh.f32 %v146_v16 }
 0x18a   :  { %v395_v19 = vpop.eup %394 }
 0x18b   :  { %149 = vrot.lane.b32.xlu0 %v395_v19, %s501_s1 }
 0x1fd   :  { %v150_v20 = vpop.permute.xlu0 %149 }
 0x1fe   :  { %v152_v21 = vmul.f32 %v393_v14, %v150_v20 }
 0x200   :  { %v153_v22 = vpack.c.bf16 %v152_v21, %v152_v21 }
 0x202   :  { %163 = vrot.lane.b32.xlu1 %v153_v22, %s502_s22 }
 0x274   :  { %v164_v23 = vpop.permute.xlu1 %163 }
 0x275   :  { %368 = vmatmul.mubr.msk.bf16.vlgmr.msra.gmra.mxu1 %vm165_vm3, %v164_v23 }
 0x335   :  { %v207_v25 = vpop.f32.mrf.mxu1 }
 0x336   :  { %v208_v26 = vadd.f32 %v348_v24, %v207_v25 }
 0x337   :  { %v369_v27 = vpop.f32.mrf.mxu1 }
 0x338   :  { %396 = vtanh.f32 %v208_v26  ;;  %v350_v31 = vmul.f32 -1.442695, %v208_v26 }
 0x339   :  { %v210_v28 = vpop.f32.mrf.mxu1 }
 0x33a   :  { %398 = vpow2.f32 %v350_v31 }
 0x33b   :  { %v370_v29 = vpop.f32.mrf.mxu1 }
 0x345   :  { %v397_v30 = vpop.eup %396 }
 0x346   :  { %221 = vrot.lane.b32.xlu1 %v397_v30, %s500_s4 }
 0x347   :  { %v399_v32 = vpop.eup %398 }
 0x348   :  { %v216_v33 = vadd.f32 1.0, %v399_v32 }
 0x34a   :  { %400 = vrcp.f32 %v216_v33 }
 0x357   :  { %v401_v34 = vpop.eup %400 }
 0x3b8   :  { %v222_v35 = vpop.permute.xlu1 %221 }
 0x3b9   :  { %v224_v36 = vmul.f32 %v401_v34, %v222_v35 }
 0x3bb   :  { %402 = vtanh.f32 %v224_v36 }
 0x3c8   :  { %v403_v37 = vpop.eup %402 }
 0x3c9   :  { %227 = vrot.lane.b32.xlu0 %v403_v37, %s501_s1 }
 0x3cd   :  { %235 = vperm.xlu0 %386, %v232_v38  }
 0x43b   :  { %v228_v40 = vpop.permute.xlu0 %227 }
 0x43c   :  { %v230_v41 = vmul.f32 %v401_v34, %v228_v40 }
 0x43e   :  { %239 = vrot.lane.b32.xlu1 %v230_v41, %s502_s22 }
 0x448   :  { %v236_v44 = vpop.permute.xlu0 %235 }
 0x4b0   :  { %v240_v42 = vpop.permute.xlu1 %239 }
 0x4b1   :  { %372 = vmatpush3.xpose.msk.msra.mxu0 %vm165_vm3, %v240_v42 }
 0x4b4   :  { %374 = vmatmul.mubr.msk.f32.vlgmr.msra.gmra.mxu0 %vm165_vm3, %v231_v43 }
 0x574   :  { %v312_v45 = vpop.f32.mrf.mxu0 }
 0x575   :  { %v313_v46 = vadd.f32 %v312_v45, %v236_v44 }
 0x576   :  { %v375_v47 = vpop.f32.mrf.mxu0 }
 0x577   :  { %v317_v48 = vsel %vm316_vm4, %v313_v46, -inf }
 0x578   :  { %v318_v49 = vrot.slane %v317_v48, 4 }
 0x57a   :  { %v319_v50 = vmax.f32 %v317_v48, %v318_v49 }
 0x57c   :  { %v320_v51 = vrot.slane %v319_v50, 2 }
 0x57e   :  { %v321_v52 = vmax.f32 %v319_v50, %v320_v51 }
 0x580   :  { %v322_v53 = vrot.slane %v321_v52, 1 }
 0x582   :  { %v323_v54 = vmax.f32 %v321_v52, %v322_v53 }
 0x584   :  { %v324_v55 = vsub.f32 %v313_v46, %v323_v54 }
 0x586   :  { %v325_v56 = vmul.f32 1.442695, %v324_v55 }
 0x588   :  { %404 = vpow2.f32 %v325_v56 }
 0x595   :  { %v405_v57 = vpop.eup %404 }
 0x596   :  { %v327_v58 = vsel %vm316_vm4, %v405_v57, 0.0 }
 0x597   :  { %v328_v59 = vrot.slane %v327_v58, 4 }
 0x599   :  { %v329_v60 = vadd.f32 %v328_v59, %v327_v58 }
 0x59b   :  { %v330_v61 = vrot.slane %v329_v60, 2 }
 0x59d   :  { %v331_v62 = vadd.f32 %v330_v61, %v329_v60 }
 0x59f   :  { %v332_v63 = vrot.slane %v331_v62, 1 }
 0x5a1   :  { %v333_v0 = vadd.f32 %v332_v63, %v331_v62 }
 0x5a3   :  { %406 = vrcp.f32 %v333_v0 }
 0x5b0   :  { %v407_v1 = vpop.eup %406 }
 0x5b1   :  { %v335_v2 = vmul.f32 %v407_v1, %v405_v57 }
 0x5b3   :  { %336 = vst.msk [vmem:[%s585_s7] sm:$0xff] %vm316_vm4, %v335_v2 }
 0x5b4   :  { %341 = vsyncpa [#allocation3], 1 }
 0x5b5   :  { %342 = vsyncpa [#allocation5], 1 }
 0x5b6   :  { %343 = vsyncpa [#allocation8], 1 }

</bundles_post_ra>
